<compile_context>
chip_gen: v7x
topology: tpu7x:2x2x1
jax: 0.10.0
libtpu: 0.0.40
codegen_flags: <defaults>
</compile_context>

<pallas_src>
import math

import numpy as np
import jax
import jax.numpy as jnp
from jax import lax
from jax.experimental import pallas as pl
from jax.experimental.pallas import tpu as pltpu

# ---- static model config (small, consistent with the module) ----
B = 2            # batch
S = 8            # sequence length
D = 32           # d_model ("features")
H = 4            # num heads
DK = D // H      # head dim
DFF = 64         # feed-forward hidden
N = B * S        # packed tokens
HN = H * N       # head-major packed rows
EPS = 1e-6
NEG_INF = -1e9
LANES = 128

# misc slab (f32, (8 + HN, 128)): row layout, every row starts at lane 0
_ROW_LN1A, _ROW_LN1B, _ROW_BQKV, _ROW_BO = 0, 1, 2, 3
_ROW_LN2A, _ROW_LN2B, _ROW_B1, _ROW_B2 = 4, 5, 6, 7
_ROW_MASK = 8
MISC_ROWS = _ROW_MASK + HN            # 72

# weight slab (bf16, (W_ROWS, 128)): sublane offsets of each matrix
_W_QKV, _W_O, _W_1, _W_2 = 0, D, 2 * D, 3 * D
W_ROWS = 3 * D + DFF                  # 160


def _head_batch_allow_np():
    """Static (HN, HN) bool: row i may attend col j iff same head AND same batch."""
    idx = np.arange(HN)
    h = idx // N
    b = (idx % N) // S
    return (h[:, None] == h[None, :]) & (b[:, None] == b[None, :])


_ALLOW_NP = _head_batch_allow_np()    # trace-time constant (depends only on static B, S, H)


def _layer_norm(x, alpha, bias):
    # x: (N, D); alpha, bias: (1, D).
    # torch .std(dim=-1) default is unbiased (N-1); eps is added to std (not inside sqrt).
    # Two-pass variance (sum of squared deviations) to avoid E[x^2]-E[x]^2 cancellation.
    mean = jnp.mean(x, axis=-1, keepdims=True)
    c = x - mean
    var = jnp.sum(c * c, axis=-1, keepdims=True) * (1.0 / (D - 1.0))
    std = jnp.sqrt(var)
    inv = pl.reciprocal(std + EPS, approx=True)        # EUP slot, frees VPU
    return alpha * c * inv + bias


def encoder_block_kernel(x_ref, misc_ref, w_ref, o_ref):
    x = x_ref[...]                                     # (N, D) f32, all tokens packed

    # ---- static slices of the misc slab (f32) ----
    ln1_a = misc_ref[_ROW_LN1A:_ROW_LN1A + 1, :D]
    ln1_b = misc_ref[_ROW_LN1B:_ROW_LN1B + 1, :D]
    bqkv  = misc_ref[_ROW_BQKV:_ROW_BQKV + 1, :3 * D]
    bo    = misc_ref[_ROW_BO:_ROW_BO + 1, :D]
    ln2_a = misc_ref[_ROW_LN2A:_ROW_LN2A + 1, :D]
    ln2_b = misc_ref[_ROW_LN2B:_ROW_LN2B + 1, :D]
    b1    = misc_ref[_ROW_B1:_ROW_B1 + 1, :DFF]
    b2    = misc_ref[_ROW_B2:_ROW_B2 + 1, :D]
    # Additive attention mask over head-major packed rows/cols, fully precomputed
    # (same-head AND same-batch block-diagonal baked at trace time, key mask folded in).
    neg = misc_ref[_ROW_MASK:_ROW_MASK + HN, :HN]      # (HN, HN) f32, 0 or -1e9

    # ---- static slices of the bf16 weight slab ----
    wqkv = w_ref[_W_QKV:_W_QKV + D, 0:3 * D]           # (D, 3D) bf16
    wo   = w_ref[_W_O:_W_O + D, 0:D]                   # (D, D)
    w1   = w_ref[_W_1:_W_1 + D, 0:DFF]                 # (D, DFF)
    w2   = w_ref[_W_2:_W_2 + DFF, 0:D]                 # (DFF, D)

    # -------- residual connection 0: self-attention on LayerNorm(x) --------
    y = _layer_norm(x, ln1_a, ln1_b)
    qkv = jnp.dot(y.astype(jnp.bfloat16), wqkv,
                  preferred_element_type=jnp.float32) + bqkv       # (N, 3D), fused QKV

    # Head-major relayout (N, D) -> (H*N, DK): row h*N + n holds head h of token n.
    # Built from static lane slices + a sublane concat (no in-kernel transpose).
    q_hm = jnp.concatenate([qkv[:, h * DK:(h + 1) * DK] for h in range(H)], axis=0)
    k_hm = jnp.concatenate([qkv[:, D + h * DK:D + (h + 1) * DK] for h in range(H)], axis=0)
    v_hm = jnp.concatenate([qkv[:, 2 * D + h * DK:2 * D + (h + 1) * DK] for h in range(H)],
                           axis=0)

    scale = 1.0 / math.sqrt(DK)
    # ONE score matmul for all heads/batches; cross-head/cross-batch/masked-key entries
    # get -1e9 (softmax underflows them to exactly 0).
    s = lax.dot_general(q_hm.astype(jnp.bfloat16), k_hm.astype(jnp.bfloat16),
                        (((1,), (1,)), ((), ())),
                        preferred_element_type=jnp.float32) * scale + neg     # (HN, HN)
    m = jnp.max(s, axis=-1, keepdims=True)
    e = jnp.exp(s - m)
    p = e * pl.reciprocal(jnp.sum(e, axis=-1, keepdims=True), approx=True)
    ctx_hm = jnp.dot(p.astype(jnp.bfloat16), v_hm.astype(jnp.bfloat16),
                     preferred_element_type=jnp.float32)                      # (HN, DK)

    # Repack (H*N, DK) -> (N, D): sublane slices + lane concat.
    ctx = jnp.concatenate([ctx_hm[h * N:(h + 1) * N, :] for h in range(H)], axis=1)

    attn = jnp.dot(ctx.astype(jnp.bfloat16), wo,
                   preferred_element_type=jnp.float32) + bo
    # TODO(synk): dropout is identity in eval mode; training-mode dropout not implemented.
    x = x + attn

    # -------- residual connection 1: feed-forward on LayerNorm(x) --------
    y = _layer_norm(x, ln2_a, ln2_b)
    hdn = jnp.maximum(jnp.dot(y.astype(jnp.bfloat16), w1,
                              preferred_element_type=jnp.float32) + b1, 0.0)
    ff = jnp.dot(hdn.astype(jnp.bfloat16), w2,
                 preferred_element_type=jnp.float32) + b2
    # D=32 -> masked (32/128-lane) store; unavoidable at this d_model.
    o_ref[...] = x + ff


def encoder_block(x, src_mask, params):
    """x: (B, S, D) f32; src_mask: (B, 1, S) f32 (1=attend, 0=masked); params: dict of f32."""
    x_flat = x.reshape(N, D)

    # ---- misc slab: LN params, all biases, and the full additive attention mask ----
    keym = src_mask.astype(jnp.float32).reshape(1, N)                 # key j = b*S + s
    keym_hm = jnp.tile(keym, (1, H))                                  # head-major columns
    allow = jnp.logical_and(jnp.asarray(_ALLOW_NP), keym_hm != 0.0)   # static block-diag & keym
    neg = jnp.where(allow, 0.0, NEG_INF).astype(jnp.float32)          # (HN, HN)

    bqkv = jnp.concatenate([params["bq"], params["bk"], params["bv"]], axis=1)  # (1, 3D)

    misc = jnp.zeros((MISC_ROWS, LANES), jnp.float32)
    misc = misc.at[_ROW_LN1A, :D].set(params["ln1_a"][0])
    misc = misc.at[_ROW_LN1B, :D].set(params["ln1_b"][0])
    misc = misc.at[_ROW_BQKV, :3 * D].set(bqkv[0])
    misc = misc.at[_ROW_BO, :D].set(params["bo"][0])
    misc = misc.at[_ROW_LN2A, :D].set(params["ln2_a"][0])
    misc = misc.at[_ROW_LN2B, :D].set(params["ln2_b"][0])
    misc = misc.at[_ROW_B1, :DFF].set(params["b1"][0])
    misc = misc.at[_ROW_B2, :D].set(params["b2"][0])
    misc = misc.at[_ROW_MASK:_ROW_MASK + HN, :HN].set(neg)

    # ---- bf16 weight slab: Wqkv / Wo / W1 / W2 stacked along sublanes ----
    wqkv = jnp.concatenate([params["wq"], params["wk"], params["wv"]], axis=1)  # (D, 3D)
    wslab = jnp.zeros((W_ROWS, LANES), jnp.float32)
    wslab = wslab.at[_W_QKV:_W_QKV + D, :3 * D].set(wqkv)
    wslab = wslab.at[_W_O:_W_O + D, :D].set(params["wo"])
    wslab = wslab.at[_W_1:_W_1 + D, :DFF].set(params["w1"])
    wslab = wslab.at[_W_2:_W_2 + DFF, :D].set(params["w2"])
    wslab = wslab.astype(jnp.bfloat16)

    out = pl.pallas_call(
        encoder_block_kernel,
        out_shape=jax.ShapeDtypeStruct((N, D), jnp.float32),
        # No grid: single invocation, whole arrays resident in VMEM, no pipeline bookkeeping.
        in_specs=[
            pl.BlockSpec(memory_space=pltpu.MemorySpace.VMEM),   # x (all batches, packed)
            pl.BlockSpec(memory_space=pltpu.MemorySpace.VMEM),   # misc slab (params + mask)
            pl.BlockSpec(memory_space=pltpu.MemorySpace.VMEM),   # bf16 weight slab
        ],
        out_specs=pl.BlockSpec(memory_space=pltpu.MemorySpace.VMEM),
    )(x_flat, misc, wslab)
    return out.reshape(B, S, D)


def init_params(key):
    ks = jax.random.split(key, 10)
    init = lambda k, shape, scale: (scale * jax.random.normal(k, shape)).astype(jnp.float32)
    # nn.Linear(Din, Dout).weight has shape (Dout, Din); we store the transpose (Din, Dout)
    # so the kernel computes y @ W + b == y @ weight.T + b.
    return {
        "ln1_a": jnp.ones((1, D), jnp.float32),
        "ln1_b": jnp.zeros((1, D), jnp.float32),
        "wq": init(ks[0], (D, D), 0.05), "bq": init(ks[1], (1, D), 0.02),
        "wk": init(ks[2], (D, D), 0.05), "bk": init(ks[3], (1, D), 0.02),
        "wv": init(ks[4], (D, D), 0.05), "bv": init(ks[5], (1, D), 0.02),
        "wo": init(ks[6], (D, D), 0.05), "bo": init(ks[7], (1, D), 0.02),
        "ln2_a": jnp.ones((1, D), jnp.float32),
        "ln2_b": jnp.zeros((1, D), jnp.float32),
        "w1": init(ks[8], (D, DFF), 0.05), "b1": jnp.zeros((1, DFF), jnp.float32),
        "w2": init(ks[9], (DFF, D), 0.05), "b2": jnp.zeros((1, D), jnp.float32),
    }


def reference(x, src_mask, params):
    """Pure-JAX f32 reference matching the PyTorch EncoderBlock (eval mode)."""
    def ln(z, a, b):
        mean = jnp.mean(z, axis=-1, keepdims=True)
        std = jnp.sqrt(jnp.sum((z - mean) ** 2, axis=-1, keepdims=True) / (D - 1))
        return a * (z - mean) / (std + EPS) + b

    def mha(y, mask):
        q = y @ params["wq"] + params["bq"]
        k = y @ params["wk"] + params["bk"]
        v = y @ params["wv"] + params["bv"]
        qh = q.reshape(B, S, H, DK).transpose(0, 2, 1, 3)
        kh = k.reshape(B, S, H, DK).transpose(0, 2, 1, 3)
        vh = v.reshape(B, S, H, DK).transpose(0, 2, 1, 3)
        s = jnp.einsum("bhqd,bhkd->bhqk", qh, kh) / math.sqrt(DK)
        s = jnp.where(mask[:, None, :, :] == 0.0, NEG_INF, s)
        p = jax.nn.softmax(s, axis=-1)
        ctx = jnp.einsum("bhqk,bhkd->bhqd", p, vh).transpose(0, 2, 1, 3).reshape(B, S, D)
        return ctx @ params["wo"] + params["bo"]

    y = ln(x, params["ln1_a"], params["ln1_b"])
    x = x + mha(y, src_mask)
    y = ln(x, params["ln2_a"], params["ln2_b"])
    hdn = jnp.maximum(y @ params["w1"] + params["b1"], 0.0)
    return x + hdn @ params["w2"] + params["b2"]


if __name__ == "__main__":
    key = jax.random.PRNGKey(0)
    kx, kp = jax.random.split(key)

    x = jax.random.normal(kx, (B, S, D), dtype=jnp.float32)
    # src_mask: 1 = attend, 0 = masked.  Mask out the last 2 key positions of batch 1.
    mask = jnp.ones((B, 1, S), jnp.float32)
    mask = mask.at[1, 0, S - 2:].set(0.0)

    params = init_params(kp)

    out = encoder_block(x, mask, params)
    out = jax.block_until_ready(out)

    assert out.shape == (B, S, D)
    assert bool(jnp.all(jnp.isfinite(out)))

    ref = reference(x, mask, params)
    max_err = float(jnp.max(jnp.abs(out - ref)))
    # bf16 MXU operands + approx reciprocals => not a bit-match; tolerance covers it comfortably.
    assert max_err < 3e-2, f"max abs error vs reference: {max_err}"

    print("KERNEL_OK")
</pallas_src>

<mosaic_0001>
module attributes {stable_mosaic.version = 11 : i64} {
  func.func @encoder_block_kernel(%arg0: memref<16x32xf32, #tpu.memory_space<vmem>>, %arg1: memref<72x128xf32, #tpu.memory_space<vmem>>, %arg2: memref<160x128xbf16, #tpu.memory_space<vmem>>, %arg3: memref<16x32xf32, #tpu.memory_space<vmem>>) attributes {dimension_semantics = [], scalar_prefetch = 0 : i64, scratch_operands = 0 : i64, tpu.core_type = #tpu.core_type<tc>} {
    %c0 = arith.constant 0 : index
    %c0_0 = arith.constant 0 : index
    %0 = vector.load %arg0[%c0, %c0_0] : memref<16x32xf32, #tpu.memory_space<vmem>>, vector<16x32xf32>
    %c0_1 = arith.constant 0 : index
    %c0_2 = arith.constant 0 : index
    %1 = vector.load %arg1[%c0_1, %c0_2] : memref<72x128xf32, #tpu.memory_space<vmem>>, vector<1x32xf32>
    %c1 = arith.constant 1 : index
    %c0_3 = arith.constant 0 : index
    %2 = vector.load %arg1[%c1, %c0_3] : memref<72x128xf32, #tpu.memory_space<vmem>>, vector<1x32xf32>
    %c2 = arith.constant 2 : index
    %c0_4 = arith.constant 0 : index
    %3 = vector.load %arg1[%c2, %c0_4] : memref<72x128xf32, #tpu.memory_space<vmem>>, vector<1x96xf32>
    %c3 = arith.constant 3 : index
    %c0_5 = arith.constant 0 : index
    %4 = vector.load %arg1[%c3, %c0_5] : memref<72x128xf32, #tpu.memory_space<vmem>>, vector<1x32xf32>
    %c4 = arith.constant 4 : index
    %c0_6 = arith.constant 0 : index
    %5 = vector.load %arg1[%c4, %c0_6] : memref<72x128xf32, #tpu.memory_space<vmem>>, vector<1x32xf32>
    %c5 = arith.constant 5 : index
    %c0_7 = arith.constant 0 : index
    %6 = vector.load %arg1[%c5, %c0_7] : memref<72x128xf32, #tpu.memory_space<vmem>>, vector<1x32xf32>
    %c6 = arith.constant 6 : index
    %c0_8 = arith.constant 0 : index
    %7 = vector.load %arg1[%c6, %c0_8] : memref<72x128xf32, #tpu.memory_space<vmem>>, vector<1x64xf32>
    %c7 = arith.constant 7 : index
    %c0_9 = arith.constant 0 : index
    %8 = vector.load %arg1[%c7, %c0_9] : memref<72x128xf32, #tpu.memory_space<vmem>>, vector<1x32xf32>
    %c8 = arith.constant 8 : index
    %c0_10 = arith.constant 0 : index
    %9 = vector.load %arg1[%c8, %c0_10] : memref<72x128xf32, #tpu.memory_space<vmem>>, vector<64x64xf32>
    %c0_11 = arith.constant 0 : index
    %c0_12 = arith.constant 0 : index
    %10 = vector.load %arg2[%c0_11, %c0_12] : memref<160x128xbf16, #tpu.memory_space<vmem>>, vector<32x96xbf16>
    %c32 = arith.constant 32 : index
    %c0_13 = arith.constant 0 : index
    %11 = vector.load %arg2[%c32, %c0_13] : memref<160x128xbf16, #tpu.memory_space<vmem>>, vector<32x32xbf16>
    %c64 = arith.constant 64 : index
    %c0_14 = arith.constant 0 : index
    %12 = vector.load %arg2[%c64, %c0_14] : memref<160x128xbf16, #tpu.memory_space<vmem>>, vector<32x64xbf16>
    %c96 = arith.constant 96 : index
    %c0_15 = arith.constant 0 : index
    %13 = vector.load %arg2[%c96, %c0_15] : memref<160x128xbf16, #tpu.memory_space<vmem>>, vector<64x32xbf16>
    %cst = arith.constant dense<0.000000e+00> : vector<16xf32>
    %14 = vector.multi_reduction <add>, %0, %cst [1] : vector<16x32xf32> to vector<16xf32>
    %15 = vector.shape_cast %14 : vector<16xf32> to vector<16x1xf32>
    %cst_16 = arith.constant 3.200000e+01 : f32
    %16 = vector.broadcast %cst_16 : f32 to vector<16x1xf32>
    %17 = arith.divf %15, %16 : vector<16x1xf32>
    %18 = vector.broadcast %17 : vector<16x1xf32> to vector<16x32xf32>
    %19 = arith.subf %0, %18 : vector<16x32xf32>
    %20 = arith.mulf %19, %19 : vector<16x32xf32>
    %cst_17 = arith.constant dense<0.000000e+00> : vector<16xf32>
    %21 = vector.multi_reduction <add>, %20, %cst_17 [1] : vector<16x32xf32> to vector<16xf32>
    %22 = vector.shape_cast %21 : vector<16xf32> to vector<16x1xf32>
    %cst_18 = arith.constant 0.0322580636 : f32
    %23 = vector.broadcast %cst_18 : f32 to vector<16x1xf32>
    %24 = arith.mulf %22, %23 : vector<16x1xf32>
    %25 = math.sqrt %24 : vector<16x1xf32>
    %cst_19 = arith.constant 9.99999997E-7 : f32
    %26 = vector.broadcast %cst_19 : f32 to vector<16x1xf32>
    %27 = arith.addf %25, %26 : vector<16x1xf32>
    %28 = tpu.reciprocal %27 {approx = true} : vector<16x1xf32> -> vector<16x1xf32>
    %29 = vector.broadcast %1 : vector<1x32xf32> to vector<16x32xf32>
    %30 = arith.mulf %29, %19 : vector<16x32xf32>
    %31 = vector.broadcast %28 : vector<16x1xf32> to vector<16x32xf32>
    %32 = arith.mulf %30, %31 : vector<16x32xf32>
    %33 = vector.broadcast %2 : vector<1x32xf32> to vector<16x32xf32>
    %34 = arith.addf %32, %33 : vector<16x32xf32>
    %35 = arith.truncf %34 : vector<16x32xf32> to vector<16x32xbf16>
    %cst_20 = arith.constant dense<0.000000e+00> : vector<16x96xf32>
    %36 = tpu.matmul %35, %10, %cst_20 {dimension_numbers = #tpu.dot_dimension_numbers<[1], [0], [0], [1], [0, 0, 1, 1], [], []>} : vector<16x32xbf16>, vector<32x96xbf16>, vector<16x96xf32> -> vector<16x96xf32>
    %37 = vector.broadcast %3 : vector<1x96xf32> to vector<16x96xf32>
    %38 = arith.addf %36, %37 : vector<16x96xf32>
    %39 = vector.extract_strided_slice %38 {offsets = [0, 0], sizes = [16, 8], strides = [1, 1]} : vector<16x96xf32> to vector<16x8xf32>
    %40 = vector.extract_strided_slice %38 {offsets = [0, 8], sizes = [16, 8], strides = [1, 1]} : vector<16x96xf32> to vector<16x8xf32>
    %41 = vector.extract_strided_slice %38 {offsets = [0, 16], sizes = [16, 8], strides = [1, 1]} : vector<16x96xf32> to vector<16x8xf32>
    %42 = vector.extract_strided_slice %38 {offsets = [0, 24], sizes = [16, 8], strides = [1, 1]} : vector<16x96xf32> to vector<16x8xf32>
    %43 = tpu.concatenate %39, %40, %41, %42 in 0 : vector<16x8xf32>, vector<16x8xf32>, vector<16x8xf32>, vector<16x8xf32> -> vector<64x8xf32>
    %44 = vector.extract_strided_slice %38 {offsets = [0, 32], sizes = [16, 8], strides = [1, 1]} : vector<16x96xf32> to vector<16x8xf32>
    %45 = vector.extract_strided_slice %38 {offsets = [0, 40], sizes = [16, 8], strides = [1, 1]} : vector<16x96xf32> to vector<16x8xf32>
    %46 = vector.extract_strided_slice %38 {offsets = [0, 48], sizes = [16, 8], strides = [1, 1]} : vector<16x96xf32> to vector<16x8xf32>
    %47 = vector.extract_strided_slice %38 {offsets = [0, 56], sizes = [16, 8], strides = [1, 1]} : vector<16x96xf32> to vector<16x8xf32>
    %48 = tpu.concatenate %44, %45, %46, %47 in 0 : vector<16x8xf32>, vector<16x8xf32>, vector<16x8xf32>, vector<16x8xf32> -> vector<64x8xf32>
    %49 = vector.extract_strided_slice %38 {offsets = [0, 64], sizes = [16, 8], strides = [1, 1]} : vector<16x96xf32> to vector<16x8xf32>
    %50 = vector.extract_strided_slice %38 {offsets = [0, 72], sizes = [16, 8], strides = [1, 1]} : vector<16x96xf32> to vector<16x8xf32>
    %51 = vector.extract_strided_slice %38 {offsets = [0, 80], sizes = [16, 8], strides = [1, 1]} : vector<16x96xf32> to vector<16x8xf32>
    %52 = vector.extract_strided_slice %38 {offsets = [0, 88], sizes = [16, 8], strides = [1, 1]} : vector<16x96xf32> to vector<16x8xf32>
    %53 = tpu.concatenate %49, %50, %51, %52 in 0 : vector<16x8xf32>, vector<16x8xf32>, vector<16x8xf32>, vector<16x8xf32> -> vector<64x8xf32>
    %54 = arith.truncf %43 : vector<64x8xf32> to vector<64x8xbf16>
    %55 = arith.truncf %48 : vector<64x8xf32> to vector<64x8xbf16>
    %cst_21 = arith.constant dense<0.000000e+00> : vector<64x64xf32>
    %56 = tpu.matmul %54, %55, %cst_21 {dimension_numbers = #tpu.dot_dimension_numbers<[1], [1], [0], [0], [0, 0, 1, 0], [], []>} : vector<64x8xbf16>, vector<64x8xbf16>, vector<64x64xf32> -> vector<64x64xf32>
    %cst_22 = arith.constant 0.353553385 : f32
    %57 = vector.broadcast %cst_22 : f32 to vector<64x64xf32>
    %58 = arith.mulf %56, %57 : vector<64x64xf32>
    %59 = arith.addf %58, %9 : vector<64x64xf32>
    %cst_23 = arith.constant dense<0xFF800000> : vector<64xf32>
    %60 = vector.multi_reduction <maximumf>, %59, %cst_23 [1] : vector<64x64xf32> to vector<64xf32>
    %61 = vector.shape_cast %60 : vector<64xf32> to vector<64x1xf32>
    %62 = vector.broadcast %61 : vector<64x1xf32> to vector<64x64xf32>
    %63 = arith.subf %59, %62 : vector<64x64xf32>
    %64 = math.exp %63 : vector<64x64xf32>
    %cst_24 = arith.constant dense<0.000000e+00> : vector<64xf32>
    %65 = vector.multi_reduction <add>, %64, %cst_24 [1] : vector<64x64xf32> to vector<64xf32>
    %66 = vector.shape_cast %65 : vector<64xf32> to vector<64x1xf32>
    %67 = tpu.reciprocal %66 {approx = true} : vector<64x1xf32> -> vector<64x1xf32>
    %68 = vector.broadcast %67 : vector<64x1xf32> to vector<64x64xf32>
    %69 = arith.mulf %64, %68 : vector<64x64xf32>
    %70 = arith.truncf %69 : vector<64x64xf32> to vector<64x64xbf16>
    %71 = arith.truncf %53 : vector<64x8xf32> to vector<64x8xbf16>
    %cst_25 = arith.constant dense<0.000000e+00> : vector<64x8xf32>
    %72 = tpu.matmul %70, %71, %cst_25 {dimension_numbers = #tpu.dot_dimension_numbers<[1], [0], [0], [1], [0, 0, 1, 1], [], []>} : vector<64x64xbf16>, vector<64x8xbf16>, vector<64x8xf32> -> vector<64x8xf32>
    %73 = vector.extract_strided_slice %72 {offsets = [0, 0], sizes = [16, 8], strides = [1, 1]} : vector<64x8xf32> to vector<16x8xf32>
    %74 = vector.extract_strided_slice %72 {offsets = [16, 0], sizes = [16, 8], strides = [1, 1]} : vector<64x8xf32> to vector<16x8xf32>
    %75 = vector.extract_strided_slice %72 {offsets = [32, 0], sizes = [16, 8], strides = [1, 1]} : vector<64x8xf32> to vector<16x8xf32>
    %76 = vector.extract_strided_slice %72 {offsets = [48, 0], sizes = [16, 8], strides = [1, 1]} : vector<64x8xf32> to vector<16x8xf32>
    %77 = tpu.concatenate %73, %74, %75, %76 in 1 : vector<16x8xf32>, vector<16x8xf32>, vector<16x8xf32>, vector<16x8xf32> -> vector<16x32xf32>
    %78 = arith.truncf %77 : vector<16x32xf32> to vector<16x32xbf16>
    %cst_26 = arith.constant dense<0.000000e+00> : vector<16x32xf32>
    %79 = tpu.matmul %78, %11, %cst_26 {dimension_numbers = #tpu.dot_dimension_numbers<[1], [0], [0], [1], [0, 0, 1, 1], [], []>} : vector<16x32xbf16>, vector<32x32xbf16>, vector<16x32xf32> -> vector<16x32xf32>
    %80 = vector.broadcast %4 : vector<1x32xf32> to vector<16x32xf32>
    %81 = arith.addf %79, %80 : vector<16x32xf32>
    %82 = arith.addf %0, %81 : vector<16x32xf32>
    %cst_27 = arith.constant dense<0.000000e+00> : vector<16xf32>
    %83 = vector.multi_reduction <add>, %82, %cst_27 [1] : vector<16x32xf32> to vector<16xf32>
    %84 = vector.shape_cast %83 : vector<16xf32> to vector<16x1xf32>
    %cst_28 = arith.constant 3.200000e+01 : f32
    %85 = vector.broadcast %cst_28 : f32 to vector<16x1xf32>
    %86 = arith.divf %84, %85 : vector<16x1xf32>
    %87 = vector.broadcast %86 : vector<16x1xf32> to vector<16x32xf32>
    %88 = arith.subf %82, %87 : vector<16x32xf32>
    %89 = arith.mulf %88, %88 : vector<16x32xf32>
    %cst_29 = arith.constant dense<0.000000e+00> : vector<16xf32>
    %90 = vector.multi_reduction <add>, %89, %cst_29 [1] : vector<16x32xf32> to vector<16xf32>
    %91 = vector.shape_cast %90 : vector<16xf32> to vector<16x1xf32>
    %cst_30 = arith.constant 0.0322580636 : f32
    %92 = vector.broadcast %cst_30 : f32 to vector<16x1xf32>
    %93 = arith.mulf %91, %92 : vector<16x1xf32>
    %94 = math.sqrt %93 : vector<16x1xf32>
    %cst_31 = arith.constant 9.99999997E-7 : f32
    %95 = vector.broadcast %cst_31 : f32 to vector<16x1xf32>
    %96 = arith.addf %94, %95 : vector<16x1xf32>
    %97 = tpu.reciprocal %96 {approx = true} : vector<16x1xf32> -> vector<16x1xf32>
    %98 = vector.broadcast %5 : vector<1x32xf32> to vector<16x32xf32>
    %99 = arith.mulf %98, %88 : vector<16x32xf32>
    %100 = vector.broadcast %97 : vector<16x1xf32> to vector<16x32xf32>
    %101 = arith.mulf %99, %100 : vector<16x32xf32>
    %102 = vector.broadcast %6 : vector<1x32xf32> to vector<16x32xf32>
    %103 = arith.addf %101, %102 : vector<16x32xf32>
    %104 = arith.truncf %103 : vector<16x32xf32> to vector<16x32xbf16>
    %cst_32 = arith.constant dense<0.000000e+00> : vector<16x64xf32>
    %105 = tpu.matmul %104, %12, %cst_32 {dimension_numbers = #tpu.dot_dimension_numbers<[1], [0], [0], [1], [0, 0, 1, 1], [], []>} : vector<16x32xbf16>, vector<32x64xbf16>, vector<16x64xf32> -> vector<16x64xf32>
    %106 = vector.broadcast %7 : vector<1x64xf32> to vector<16x64xf32>
    %107 = arith.addf %105, %106 : vector<16x64xf32>
    %cst_33 = arith.constant 0.000000e+00 : f32
    %108 = vector.broadcast %cst_33 : f32 to vector<16x64xf32>
    %109 = arith.maximumf %107, %108 : vector<16x64xf32>
    %110 = arith.truncf %109 : vector<16x64xf32> to vector<16x64xbf16>
    %cst_34 = arith.constant dense<0.000000e+00> : vector<16x32xf32>
    %111 = tpu.matmul %110, %13, %cst_34 {dimension_numbers = #tpu.dot_dimension_numbers<[1], [0], [0], [1], [0, 0, 1, 1], [], []>} : vector<16x64xbf16>, vector<64x32xbf16>, vector<16x32xf32> -> vector<16x32xf32>
    %112 = vector.broadcast %8 : vector<1x32xf32> to vector<16x32xf32>
    %113 = arith.addf %111, %112 : vector<16x32xf32>
    %114 = arith.addf %82, %113 : vector<16x32xf32>
    %c0_35 = arith.constant 0 : index
    %c0_36 = arith.constant 0 : index
    %115 = vector.load %arg3[%c0_35, %c0_36] : memref<16x32xf32, #tpu.memory_space<vmem>>, vector<16x32xf32>
    tpu.vector_store %arg3[%c0_35, %c0_36], %114 {strides = array<i32>} : memref<16x32xf32, #tpu.memory_space<vmem>>, vector<16x32xf32>,
    return
  }
}

</mosaic_0001>

<bundles_post_ra>
// kernel: tpu_custom_call.1
= control target key start
LH: loop header
LB: loop body
LE: loop exit
PB: predicated region body
PF: predicated region fallthrough
CT: control target
= control target key end

     0   :  { %8 = vsyncpa [#allocation3], 0  ;;  %s1390_s0 = inlined_call_operand.hbm [shape: f32[16,32], index: 0, kind: input, shape index: {}]   ;;  %s1391_s1 = inlined_call_operand.hbm [shape: f32[72,128], index: 1, kind: input, shape index: {}]   ;;  %s1392_s2 = inlined_call_operand.hbm [shape: bf16[160,128], index: 2, kind: input, shape index: {}]   ;;  %s1393_s3 = inlined_call_operand.hbm [shape: f32[16,32], index: 3, kind: output, shape index: {}]  }
   0x1   :  { %9 = vsyncpa [#allocation6], 0 }
   0x2   :  { %10 = vsyncpa [#allocation4], 0  ;;  %s1169_s12 = smov [#allocation5]   ;;  %s1170_s14 = smov [#allocation2]  }
   0x3   :  { %s28_s13 = sshll.u32 %s1169_s12, 4  ;;  %s16_s15 = sshll.u32 %s1170_s14, 4  ;;  %s29_s13 = int_to_ptr.vmem [resolvable:$true] %s28_s13  ;;  %s1205_s15 = int_to_ptr.vmem [resolvable:$true] %s16_s15 }
   0x4   :  { %s1075_s18 = scalar_lea.hbm %s1391_s1, 1152 }
   0x5   :  { %p1076_p0 = scmp.ne.s32.totalorder %s1391_s1, %s1075_s18  ;;  %p1079_p1 = scmp.lt.u32.totalorder %s1075_s18, %s1391_s1 }
   0x7   :  { %p1081_p2 = pnand %p1079_p1, %p1076_p0 }
   0x9   :  { %1084 = shalt.err (!%p1081_p2)
}
   0xa   :  { %s1085_s23 = scalar_lea.vmem %s29_s13, 1152  ;;  %p1090_p4 = scmp.lt.s32.totalorder %s29_s13, %s29_s13 }
   0xb   :  { %p1086_p3 = scmp.ne.s32.totalorder %s29_s13, %s1085_s23  ;;  %p1091_p5 = scmp.lt.s32.totalorder %s1085_s23, %s1085_s23 }
   0xd   :  { %p1092_p6 = por %p1091_p5, %p1090_p4 }
   0xf   :  { %p1093_p7 = pnand %p1092_p6, %p1086_p3 }
  0x11   :  { %1096 = shalt.err (!%p1093_p7)
}
  0x12   :  { %s1171_s24 = smov 128   ;;  %s1172_s25 = smov 8  }
  0x13   :  { %34 = dma.hbm_to_vmem [thread:$0]  %s1391_s1, 1152, %s29_s13, [#allocation6], %s1171_s24, %s1171_s24, %s1172_s25  }
  0x14   :  { %s1097_s30 = scalar_lea.hbm %s1390_s0, 256 }
  0x15   :  { %p1098_p8 = scmp.ne.s32.totalorder %s1390_s0, %s1097_s30  ;;  %p1101_p9 = scmp.lt.u32.totalorder %s1097_s30, %s1390_s0 }
  0x17   :  { %p1103_p10 = pnand %p1101_p9, %p1098_p8 }
  0x19   :  { %1106 = shalt.err (!%p1103_p10)
}
  0x1a   :  { %s1107_s8 = scalar_lea.vmem %s1205_s15, 256  ;;  %p1112_p12 = scmp.lt.s32.totalorder %s1205_s15, %s1205_s15 }
  0x1b   :  { %p1108_p11 = scmp.ne.s32.totalorder %s1205_s15, %s1107_s8  ;;  %p1113_p13 = scmp.lt.s32.totalorder %s1107_s8, %s1107_s8 }
  0x1d   :  { %p1114_p0 = por %p1113_p13, %p1112_p12 }
  0x1f   :  { %p1115_p1 = pnand %p1114_p0, %p1108_p11 }
  0x21   :  { %1118 = shalt.err (!%p1115_p1)
}
  0x22   :  { %22 = dma.hbm_to_vmem [thread:$0]  %s1390_s0, 256, %s1205_s15, [#allocation3], %s1171_s24, %s1171_s24, %s1172_s25  }
  0x23   :  { %s1173_s10 = smov [#allocation7]   ;;  %s1119_s14 = scalar_lea.hbm %s1392_s2, 1280 }
  0x24   :  { %s40_s11 = sshll.u32 %s1173_s10, 4  ;;  %p1120_p2 = scmp.ne.s32.totalorder %s1392_s2, %s1119_s14  ;;  %s41_s11 = int_to_ptr.vmem [resolvable:$true] %s40_s11 }
  0x25   :  { %p1123_p3 = scmp.lt.u32.totalorder %s1119_s14, %s1392_s2 }
  0x27   :  { %p1125_p4 = pnand %p1123_p3, %p1120_p2 }
  0x29   :  { %1128 = shalt.err (!%p1125_p4)
}
  0x2a   :  { %s1129_s20 = scalar_lea.vmem %s41_s11, 1280  ;;  %p1134_p6 = scmp.lt.s32.totalorder %s41_s11, %s41_s11 }
  0x2b   :  { %p1130_p5 = scmp.ne.s32.totalorder %s41_s11, %s1129_s20  ;;  %p1135_p7 = scmp.lt.s32.totalorder %s1129_s20, %s1129_s20 }
  0x2d   :  { %p1136_p8 = por %p1135_p7, %p1134_p6 }
  0x2f   :  { %p1137_p9 = pnand %p1136_p8, %p1130_p5 }
  0x31   :  { %1140 = shalt.err (!%p1137_p9)
}
  0x32   :  { %s1174_s0 = smov 64   ;;  %s1175_s15 = smov 4  }
  0x33   :  { %46 = dma.hbm_to_vmem [thread:$0]  %s1392_s2, 1280, %s41_s11, [#allocation6], %s1174_s0, %s1174_s0, %s1175_s15  }
  0x34   :  { %1163 = dma.done.wait [#allocation3], 256  }
  0x35   :  { %1164 = vsyncadd [#allocation3], 4294967040 }
  0x36   :  { %1165 = dma.done.wait [#allocation6], 2432  }
  0x37   :  { %1166 = vsyncadd [#allocation6], 4294964864  ;;  %vm95_vm0 = vcmask 261120   ;;  %v1256_v0 = vld [vmem:[#allocation2] sm:$0xff]  ;;  %v1258_v1 = vld [vmem:[#allocation2 + $0x8] sm:$0xff]  ;;  %v1176_v15 = vmov 0.0  }
  0x38   :  { %v96_v2 = vsel %vm95_vm0, %v1256_v0, 0.0  ;;  %v99_v3 = vsel %vm95_vm0, %v1258_v1, 0.0  ;;  %v1017_v14 = vld [vmem:[#allocation7] sm:$0xff]   ;;  %899 = vmatprep.subr.bf16.mxu0 %v1176_v15  ;;  %vm1177_vm1 = vmmov 0   ;;  %v1018_v16 = vld [vmem:[#allocation7 + $0x8] sm:$0xff]   ;;  %vm246_vm6 = vcmask 64512  }
  0x39   :  { %97 = vadd.xlane.f32.xlu0 %v96_v2  ;;  %903 = vmatprep.mubr.msk.bf16.mxu0 %vm1177_vm1, %v1176_v15  ;;  %v839_v33 = vld [vmem:[#allocation5] ss:$0 sm:$0xff]  ;;  %v840_v39 = vld [vmem:[#allocation5 + $0x1] ss:$0 sm:$0xff]  ;;  %v841_v44 = vld [vmem:[#allocation5 + $0x2] ss:$0 sm:$0xff] }
  0x3a   :  { %900 = vmatpush3.bf16.msra.mxu0 %v1017_v14  ;;  %s1178_s2 = smov 112   ;;  %s1179_s23 = smov 120   ;;  %vm352_vm7 = vcmask 523264   ;;  %vm560_vm8 = vcmask 130048   ;;  %vm563_vm9 = vcmask 195584  }
  0x3b   :  { %901 = vmatprep.subr.bf16.mxu0 %v1176_v15  ;;  %s1180_s26 = smov 104   ;;  %s1181_s27 = smov 96  }
  0x3c   :  { %s1182_s28 = smov 24   ;;  %s1183_s29 = smov 16  }
  0x3d   :  { %100 = vadd.xlane.f32.xlu0 %v99_v3  ;;  %s1184_s30 = smov [#allocation8]  }
  0x3e   :  { %902 = vmatpush3.bf16.msra.mxu0 %v1018_v16  ;;  %v67_v16 = vld [vmem:[#allocation5 + $0x8] sm:$0xff]  ;;  %s826_s4 = sshll.u32 %s1184_s30, 4  ;;  %s827_s4 = int_to_ptr.vmem [resolvable:$true] %s826_s4 }
  0x3f   :  { %s1141_s5 = scalar_lea.vmem %s827_s4, 256  ;;  %p1146_p11 = scmp.lt.s32.totalorder %s827_s4, %s827_s4 }
  0x40   :  { %p1142_p10 = scmp.ne.s32.totalorder %s827_s4, %s1141_s5  ;;  %p1147_p12 = scmp.lt.s32.totalorder %s1141_s5, %s1141_s5 }
  0x42   :  { %p1148_p13 = por %p1147_p12, %p1146_p11 }
  0x44   :  { %p1149_p0 = pnand %p1148_p13, %p1142_p10 }
  0xc6   :  { %v98_v4 = vpop.xlane.xlu0 %97 }
  0xc7   :  { %v103_v5 = vmul.f32 0.03125, %v98_v4 }
  0xc9   :  { %v105_v6 = vsub.f32 %v1256_v0, %v103_v5 }
  0xca   :  { %v101_v7 = vpop.xlane.xlu0 %100 }
  0xcb   :  { %v104_v8 = vmul.f32 0.03125, %v101_v7  ;;  %v107_v9 = vmul.f32 %v105_v6, %v105_v6  ;;  %v139_v35 = vmul.f32 %v839_v33, %v105_v6 }
  0xcd   :  { %v106_v10 = vsub.f32 %v1258_v1, %v104_v8  ;;  %v109_v11 = vsel %vm95_vm0, %v107_v9, 0.0 }
  0xce   :  { %110 = vadd.xlane.f32.xlu1 %v109_v11 }
  0xcf   :  { %v108_v12 = vmul.f32 %v106_v10, %v106_v10  ;;  %v140_v36 = vmul.f32 %v839_v33, %v106_v10  ;;  %v71_v33 = vld [vmem:[#allocation5 + $0x28] sm:$0xff] }
  0xd1   :  { %v112_v13 = vsel %vm95_vm0, %v108_v12, 0.0  ;;  %v69_v12 = vld [vmem:[#allocation5 + $0x18] sm:$0xff] }
  0xd2   :  { %113 = vadd.xlane.f32.xlu1 %v112_v13 }
 0x15b   :  { %v111_v17 = vpop.xlane.xlu1 %110 }
 0x15c   :  { %v115_v18 = vmul.f32 0.032258064, %v111_v17 }
 0x15e   :  { %1027 = vrsqrt.f32 %v115_v18  ;;  %vm119_vm2 = vcmp.eq.f32.partialorder %v115_v18, inf  ;;  %v122_v23 = vand.u32 2147483648, %v115_v18  ;;  %vm121_vm3 = vcmp.eq.f32.partialorder %v115_v18, 0.0 }
 0x15f   :  { %v114_v19 = vpop.xlane.xlu1 %113 }
 0x160   :  { %v116_v20 = vmul.f32 0.032258064, %v114_v19 }
 0x162   :  { %1029 = vrsqrt.f32 %v116_v20  ;;  %vm126_vm4 = vcmp.eq.f32.partialorder %v116_v20, inf  ;;  %v129_v29 = vand.u32 2147483648, %v116_v20  ;;  %vm128_vm5 = vcmp.eq.f32.partialorder %v116_v20, 0.0 }
 0x168   :  { %v1028_v21 = vpop.eup %1027 }
 0x169   :  { %v118_v22 = vmul.f32 %v1028_v21, %v115_v18  ;;  %v68_v21 = vld [vmem:[#allocation5 + $0x10] sm:$0xff] }
 0x16b   :  { %v120_v24 = vsel %vm119_vm2, %v115_v18, %v118_v22 }
 0x16c   :  { %v1030_v25 = vpop.eup %1029  ;;  %v123_v26 = vsel %vm121_vm3, %v122_v23, %v120_v24 }
 0x16d   :  { %v131_v27 = vadd.f32 1e-06, %v123_v26  ;;  %v125_v28 = vmul.f32 %v1030_v25, %v116_v20 }
 0x16f   :  { %1031 = vrcp.f32 %v131_v27  ;;  %v127_v30 = vsel %vm126_vm4, %v116_v20, %v125_v28  ;;  %v70_v28 = vld [vmem:[#allocation5 + $0x20] sm:$0xff] }
 0x170   :  { %v130_v31 = vsel %vm128_vm5, %v129_v29, %v127_v30 }
 0x171   :  { %v132_v32 = vadd.f32 1e-06, %v130_v31 }
 0x173   :  { %1033 = vrcp.f32 %v132_v32 }
 0x179   :  { %v1032_v34 = vpop.eup %1031 }
 0x17a   :  { %v141_v37 = vmul.f32 %v1032_v34, %v139_v35 }
 0x17c   :  { %v147_v41 = vadd.f32 %v840_v39, %v141_v37 }
 0x17d   :  { %v1034_v38 = vpop.eup %1033 }
 0x17e   :  { %v142_v40 = vmul.f32 %v1034_v38, %v140_v36  ;;  %v72_v38 = vld [vmem:[#allocation5 + $0x30] sm:$0xff] }
 0x180   :  { %v148_v42 = vadd.f32 %v840_v39, %v142_v40  ;;  %v73_v39 = vld [vmem:[#allocation5 + $0x38] sm:$0xff] }
 0x182   :  { %v149_v43 = vpack.c.bf16 %v148_v42, %v147_v41 }
 0x184   :  { %904 = vmatmul.mubr.msk.bf16.vlgmr.msra.gmra.mrb[0].mxu0 %vm95_vm0, %v149_v43 }
 0x257   :  { %v203_v45 = vpop.f32.mrb[0].mxu0 }
 0x258   :  { %v905_v46 = vpop.f32.mrb[1].mxu0  ;;  %v204_v48 = vadd.f32 %v841_v44, %v203_v45 }
 0x259   :  { %v206_v47 = vpop.f32.mrb[2].mxu0 }
 0x25a   :  { %v207_v49 = vadd.f32 %v841_v44, %v206_v47  ;;  %v906_v50 = vpop.f32.mrb[3].mxu0  ;;  %v74_v47 = vld [vmem:[#allocation5 + $0x40] sm:$0xff] }
 0x25c   :  { %v992_v51 = vpack.i.bf16 %v207_v49, %v204_v48  ;;  %v1273_v52 = vpack.c.bf16 %v207_v49, %v204_v48 }
 0x25e   :  { %993 = vrot.lane.b32.xlu1 %v992_v51, %s1178_s2  ;;  %988 = vrot.lane.b32.xlu0 %v992_v51, %s1179_s23 }
 0x25f   :  { %915 = vmatprep.mubr.msk.bf16.mxu1 %vm246_vm6, %v1273_v52 }
 0x262   :  { %998 = vrot.lane.b32.xlu1 %v992_v51, %s1180_s26 }
 0x266   :  { %238 = vrot.lane.b32.xlu1 %v1273_v52, %s1181_s27 }
 0x2d0   :  { %v994_v53 = vpop.permute.xlu1 %993  ;;  %v989_v54 = vpop.permute.xlu0 %988 }
 0x2d1   :  { %v996_v55 = vunpack.i.h.bf16 %v994_v53  ;;  %v995_v56 = vunpack.i.l.bf16 %v994_v53  ;;  %v991_v57 = vunpack.i.h.bf16 %v989_v54  ;;  %v990_v58 = vunpack.i.l.bf16 %v989_v54 }
 0x2d3   :  { %v1278_v59 = vpack.c.bf16 %v996_v55, %v995_v56  ;;  %v1280_v60 = vpack.c.bf16 %v991_v57, %v990_v58 }
 0x2d4   :  { %v999_v61 = vpop.permute.xlu1 %998 }
 0x2d5   :  { %v1001_v62 = vunpack.i.h.bf16 %v999_v61  ;;  %v1000_v63 = vunpack.i.l.bf16 %v999_v61  ;;  %240 = vrot.lane.b32.xlu0 %v1280_v60, %s1181_s27  ;;  %242 = vrot.lane.b32.xlu1 %v1278_v59, %s1181_s27 }
 0x2d7   :  { %v1284_v2 = vpack.c.bf16 %v1001_v62, %v1000_v63 }
 0x2d8   :  { %v239_v3 = vpop.permute.xlu1 %238 }
 0x2d9   :  { %244 = vrot.lane.b32.xlu0 %v1284_v2, %s1181_s27  ;;  %967 = vmatprep.subr.msk.bf16.mxu1 %vm246_vm6, %v239_v3  ;;  %v260_v4 = vsel %vm246_vm6, %v239_v3, 0 }
 0x2da   :  { %908 = vmatpush3.bf16.xpose.msra.mxu1 %v260_v4 }
 0x347   :  { %v241_v5 = vpop.permute.xlu0 %240  ;;  %v243_v7 = vpop.permute.xlu1 %242 }
 0x348   :  { %968 = vmatprep.subr.msk.bf16.mxu1 %vm246_vm6, %v241_v5  ;;  %v263_v6 = vsel %vm246_vm6, %v241_v5, 0  ;;  %v266_v8 = vsel %vm246_vm6, %v243_v7, 0 }
 0x349   :  { %910 = vmatpush3.bf16.xpose.msra.mxu1 %v263_v6 }
 0x34a   :  { %969 = vmatprep.subr.msk.bf16.mxu1 %vm246_vm6, %v243_v7 }
 0x34b   :  { %v245_v9 = vpop.permute.xlu0 %244 }
 0x34c   :  { %v269_v10 = vsel %vm246_vm6, %v245_v9, 0 }
 0x351   :  { %912 = vmatpush3.bf16.xpose.msra.mxu1 %v266_v8 }
 0x352   :  { %970 = vmatprep.subr.msk.bf16.mxu1 %vm246_vm6, %v245_v9 }
 0x359   :  { %914 = vmatpush3.bf16.xpose.msra.mxu1 %v269_v10 }
 0x35a   :  { %955 = vmatprep.subr.bf16.mxu1 %v1176_v15 }
 0x360   :  { %916 = vmatmul.mubr.msk.bf16.vlgmr.msra.gmra.mrb[0].mxu1 %vm246_vm6, %v1280_v60 }
 0x361   :  { %919 = vmatprep.mubr.msk.bf16.mxu1 %vm246_vm6, %v1278_v59 }
 0x368   :  { %920 = vmatmul.mubr.msk.bf16.gmra.mrb[4].mxu1 %vm246_vm6, %v1284_v2 }
 0x369   :  { %963 = vmatprep.mubr.msk.bf16.mxu1 %vm1177_vm1, %v1176_v15 }
 0x433   :  { %v917_v11 = vpop.f32.mrb[0].mxu1 }
 0x434   :  { %v338_v13 = vmul.f32 0.35355338, %v917_v11  ;;  %v305_v14 = vpop.f32.mrb[1].mxu1 }
 0x435   :  { %v336_v17 = vmul.f32 0.35355338, %v305_v14  ;;  %v918_v18 = vpop.f32.mrb[2].mxu1 }
 0x436   :  { %v308_v19 = vpop.f32.mrb[3].mxu1  ;;  %v346_v20 = vadd.f32 %v338_v13, %v69_v12  ;;  %v339_v24 = vmul.f32 0.35355338, %v918_v18 }
 0x437   :  { %v337_v22 = vmul.f32 0.35355338, %v308_v19  ;;  %v344_v23 = vadd.f32 %v336_v17, %v67_v16 }
 0x438   :  { %v359_v25 = vsel %vm352_vm7, %v346_v20, -inf  ;;  %v347_v32 = vadd.f32 %v339_v24, %v70_v28 }
 0x439   :  { %360 = vmax.xlane.f32.xlu0 %v359_v25  ;;  %v353_v26 = vsel %vm352_vm7, %v344_v23, -inf  ;;  %v345_v27 = vadd.f32 %v337_v22, %v68_v21 }
 0x43a   :  { %354 = vmax.xlane.f32.xlu1 %v353_v26  ;;  %v362_v43 = vsel %vm352_vm7, %v347_v32, -inf }
 0x43b   :  { %v921_v29 = vpop.f32.mrb[4].mxu1  ;;  %v356_v30 = vsel %vm352_vm7, %v345_v27, -inf }
 0x43c   :  { %v321_v31 = vpop.f32.mrb[5].mxu1  ;;  %v342_v34 = vmul.f32 0.35355338, %v921_v29 }
 0x43d   :  { %v340_v35 = vmul.f32 0.35355338, %v321_v31  ;;  %357 = vmax.xlane.f32.xlu0 %v356_v30  ;;  %v922_v36 = vpop.f32.mrb[6].mxu1 }
 0x43e   :  { %v324_v37 = vpop.f32.mrb[7].mxu1  ;;  %v343_v42 = vmul.f32 0.35355338, %v922_v36  ;;  %v350_v46 = vadd.f32 %v342_v34, %v73_v39 }
 0x43f   :  { %v341_v40 = vmul.f32 0.35355338, %v324_v37  ;;  %v348_v41 = vadd.f32 %v340_v35, %v71_v33 }
 0x440   :  { %v351_v49 = vadd.f32 %v343_v42, %v74_v47  ;;  %v371_v50 = vsel %vm352_vm7, %v350_v46, -inf }
 0x441   :  { %363 = vmax.xlane.f32.xlu0 %v362_v43  ;;  %v365_v44 = vsel %vm352_vm7, %v348_v41, -inf  ;;  %v349_v45 = vadd.f32 %v341_v40, %v72_v38 }
 0x442   :  { %366 = vmax.xlane.f32.xlu1 %v365_v44  ;;  %v374_v51 = vsel %vm352_vm7, %v351_v49, -inf }
 0x443   :  { %v368_v48 = vsel %vm352_vm7, %v349_v45, -inf }
 0x445   :  { %369 = vmax.xlane.f32.xlu0 %v368_v48 }
 0x446   :  { %372 = vmax.xlane.f32.xlu1 %v371_v50 }
 0x449   :  { %375 = vmax.xlane.f32.xlu0 %v374_v51 }
 0x457   :  { %445 = vrot.lane.b32.xlu1 %v1273_v52, %s1174_s0 }
 0x4c6   :  { %v361_v53 = vpop.xlane.xlu0 %360 }
 0x4c7   :  { %v379_v54 = vsub.f32 %v346_v20, %v361_v53  ;;  %v355_v55 = vpop.xlane.xlu1 %354 }
 0x4c8   :  { %v377_v56 = vsub.f32 %v344_v23, %v355_v55 }
 0x4c9   :  { %v389_v57 = vmul.f32 1.442695, %v379_v54 }
 0x4ca   :  { %v385_v58 = vmul.f32 1.442695, %v377_v56  ;;  %v358_v61 = vpop.xlane.xlu0 %357 }
 0x4cb   :  { %1035 = vpow2.f32 %v389_v57  ;;  %v378_v62 = vsub.f32 %v345_v27, %v358_v61 }
 0x4cc   :  { %1037 = vpow2.f32 %v385_v58 }
 0x4cd   :  { %v387_v5 = vmul.f32 1.442695, %v378_v62 }
 0x4ce   :  { %v364_v63 = vpop.xlane.xlu0 %363 }
 0x4cf   :  { %v380_v3 = vsub.f32 %v347_v32, %v364_v63  ;;  %v367_v4 = vpop.xlane.xlu1 %366 }
 0x4d0   :  { %v381_v7 = vsub.f32 %v348_v41, %v367_v4 }
 0x4d1   :  { %v391_v6 = vmul.f32 1.442695, %v380_v3 }
 0x4d2   :  { %v370_v8 = vpop.xlane.xlu0 %369  ;;  %v393_v12 = vmul.f32 1.442695, %v381_v7 }
 0x4d3   :  { %1039 = vpow2.f32 %v391_v6  ;;  %v373_v9 = vpop.xlane.xlu1 %372  ;;  %v382_v11 = vsub.f32 %v349_v45, %v370_v8  ;;  %v1020_v6 = vld [vmem:[#allocation7 + $0x18] sm:$0xff]  }
 0x4d4   :  { %v383_v52 = vsub.f32 %v350_v46, %v373_v9  ;;  %1041 = vpow2.f32 %v387_v5  ;;  %v1019_v5 = vld [vmem:[#allocation7 + $0x10] sm:$0xff]  }
 0x4d5   :  { %v1314_v10 = vpop.eup %1035  ;;  %v395_v20 = vmul.f32 1.442695, %v382_v11 }
 0x4d6   :  { %v397_v13 = vmul.f32 1.442695, %v383_v52  ;;  %v376_v14 = vpop.xlane.xlu0 %375  ;;  %v407_v16 = vsel %vm352_vm7, %v1314_v10, 0.0  ;;  %v1038_v17 = vpop.eup %1037 }
 0x4d7   :  { %v384_v18 = vsub.f32 %v351_v49, %v376_v14  ;;  %408 = vadd.xlane.f32.xlu1 %v407_v16  ;;  %v446_v19 = vpop.permute.xlu1 %445  ;;  %v401_v22 = vsel %vm352_vm7, %v1038_v17, 0.0 }
 0x4d8   :  { %1043 = vpow2.f32 %v397_v13  ;;  %923 = vmatprep.subr.bf16.mxu0 %v446_v19 }
 0x4d9   :  { %v399_v21 = vmul.f32 1.442695, %v384_v18  ;;  %924 = vmatpush3.bf16.msra.mxu0 %v446_v19  ;;  %1045 = vpow2.f32 %v393_v12 }
 0x4db   :  { %1047 = vpow2.f32 %v399_v21  ;;  %402 = vadd.xlane.f32.xlu1 %v401_v22 }
 0x4dc   :  { %1049 = vpow2.f32 %v395_v20 }
 0x4dd   :  { %v1040_v23 = vpop.eup %1039 }
 0x4de   :  { %v410_v24 = vsel %vm352_vm7, %v1040_v23, 0.0  ;;  %v1042_v25 = vpop.eup %1041 }
 0x4df   :  { %411 = vadd.xlane.f32.xlu0 %v410_v24  ;;  %v404_v27 = vsel %vm352_vm7, %v1042_v25, 0.0 }
 0x4e2   :  { %v1320_v26 = vpop.eup %1043 }
 0x4e3   :  { %405 = vadd.xlane.f32.xlu0 %v404_v27  ;;  %v419_v28 = vsel %vm352_vm7, %v1320_v26, 0.0  ;;  %v1046_v29 = vpop.eup %1045 }
 0x4e4   :  { %420 = vadd.xlane.f32.xlu1 %v419_v28  ;;  %v413_v33 = vsel %vm352_vm7, %v1046_v29, 0.0 }
 0x4e5   :  { %v1048_v30 = vpop.eup %1047 }
 0x4e6   :  { %v422_v31 = vsel %vm352_vm7, %v1048_v30, 0.0  ;;  %v1050_v32 = vpop.eup %1049 }
 0x4e7   :  { %423 = vadd.xlane.f32.xlu0 %v422_v31  ;;  %v416_v34 = vsel %vm352_vm7, %v1050_v32, 0.0 }
 0x4e8   :  { %414 = vadd.xlane.f32.xlu1 %v413_v33 }
 0x4eb   :  { %417 = vadd.xlane.f32.xlu0 %v416_v34  ;;  %v853_v34 = vld [vmem:[#allocation5 + $0x3] ss:$0 sm:$0xff] }
 0x4f9   :  { %449 = vrot.lane.b32.xlu1 %v1278_v59, %s1174_s0 }
 0x4fd   :  { %451 = vrot.lane.b32.xlu1 %v1284_v2, %s1174_s0 }
 0x501   :  { %447 = vrot.lane.b32.xlu0 %v1280_v60, %s1174_s0 }
 0x564   :  { %v409_v35 = vpop.xlane.xlu1 %408 }
 0x568   :  { %v403_v36 = vpop.xlane.xlu1 %402 }
 0x569   :  { %1051 = vrcp.f32 %v403_v36 }
 0x56c   :  { %v412_v37 = vpop.xlane.xlu0 %411 }
 0x570   :  { %v406_v38 = vpop.xlane.xlu0 %405 }
 0x571   :  { %1053 = vrcp.f32 %v406_v38  ;;  %v421_v39 = vpop.xlane.xlu1 %420 }
 0x572   :  { %1055 = vrcp.f32 %v412_v37 }
 0x573   :  { %1057 = vrcp.f32 %v409_v35  ;;  %v1052_v59 = vpop.eup %1051 }
 0x574   :  { %v424_v40 = vpop.xlane.xlu0 %423  ;;  %v433_v45 = vmul.f32 %v1052_v59, %v1038_v17 }
 0x575   :  { %v415_v41 = vpop.xlane.xlu1 %414 }
 0x576   :  { %1059 = vrcp.f32 %v415_v41 }
 0x578   :  { %v418_v42 = vpop.xlane.xlu0 %417 }
 0x579   :  { %1061 = vrcp.f32 %v418_v42  ;;  %v450_v2 = vpop.permute.xlu1 %449 }
 0x57a   :  { %1063 = vrcp.f32 %v424_v40 }
 0x57b   :  { %v1054_v43 = vpop.eup %1053  ;;  %1065 = vrcp.f32 %v421_v39 }
 0x57c   :  { %v448_v44 = vpop.permute.xlu0 %447  ;;  %v434_v60 = vmul.f32 %v1054_v43, %v1042_v25  ;;  %v1056_v47 = vpop.eup %1055 }
 0x57d   :  { %925 = vmatprep.subr.bf16.mxu0 %v448_v44  ;;  %v1058_v48 = vpop.eup %1057  ;;  %v452_v50 = vpop.permute.xlu1 %451  ;;  %v436_v53 = vmul.f32 %v1056_v47, %v1040_v23 }
 0x57e   :  { %926 = vmatpush3.bf16.msra.mxu0 %v448_v44  ;;  %v441_v46 = vpack.c.bf16 %v434_v60, %v433_v45  ;;  %v435_v55 = vmul.f32 %v1058_v48, %v1314_v10 }
 0x57f   :  { %927 = vmatprep.subr.bf16.mxu0 %v450_v2 }
 0x580   :  { %931 = vmatprep.mubr.msk.bf16.mxu0 %vm352_vm7, %v441_v46  ;;  %v1060_v49 = vpop.eup %1059  ;;  %v442_v57 = vpack.c.bf16 %v436_v53, %v435_v55  ;;  %v1023_v53 = vld [vmem:[#allocation7 + $0x30] sm:$0xff]  }
 0x581   :  { %v437_v56 = vmul.f32 %v1060_v49, %v1046_v29  ;;  %956 = vmatpush3.bf16.msra.mxu1 %v1023_v53 }
 0x582   :  { %928 = vmatpush3.bf16.msra.mxu0 %v450_v2  ;;  %957 = vmatprep.subr.bf16.mxu1 %v1176_v15 }
 0x583   :  { %v1062_v51 = vpop.eup %1061  ;;  %929 = vmatprep.subr.bf16.mxu0 %v452_v50 }
 0x584   :  { %v438_v54 = vmul.f32 %v1062_v51, %v1050_v32  ;;  %v1064_v58 = vpop.eup %1063  ;;  %v1022_v51 = vld [vmem:[#allocation7 + $0x28] sm:$0xff]  }
 0x585   :  { %v1066_v62 = vpop.eup %1065  ;;  %v440_v63 = vmul.f32 %v1064_v58, %v1048_v30 }
 0x586   :  { %930 = vmatpush3.bf16.msra.mxu0 %v452_v50  ;;  %v443_v61 = vpack.c.bf16 %v438_v54, %v437_v56  ;;  %v439_v3 = vmul.f32 %v1066_v62, %v1320_v26  ;;  %v1021_v50 = vld [vmem:[#allocation7 + $0x20] sm:$0xff]   ;;  %v1024_v54 = vld [vmem:[#allocation7 + $0x38] sm:$0xff]  }
 0x587   :  { %939 = vmatprep.subr.bf16.mxu0 %v1176_v15  ;;  %958 = vmatpush3.bf16.msra.mxu1 %v1024_v54 }
 0x588   :  { %v444_v4 = vpack.c.bf16 %v440_v63, %v439_v3  ;;  %959 = vmatprep.subr.bf16.mxu1 %v1176_v15 }
 0x589   :  { %932 = vmatmul.mubr.msk.bf16.vlgmr.msra.gmra.mrb[4].mxu0 %vm352_vm7, %v442_v57 }
 0x58a   :  { %935 = vmatprep.mubr.msk.bf16.mxu0 %vm352_vm7, %v443_v61  ;;  %940 = vmatpush3.bf16.msra.mxu0 %v1019_v5 }
 0x58b   :  { %941 = vmatprep.subr.bf16.mxu0 %v1176_v15 }
 0x58e   :  { %942 = vmatpush3.bf16.msra.mxu0 %v1020_v6 }
 0x58f   :  { %947 = vmatprep.subr.bf16.mxu0 %v1176_v15 }
 0x591   :  { %936 = vmatmul.mubr.msk.bf16.gmra.mrb[8].mxu0 %vm352_vm7, %v444_v4 }
 0x592   :  { %943 = vmatprep.mubr.msk.bf16.mxu0 %vm1177_vm1, %v1176_v15 }
 0x65c   :  { %v933_v7 = vpop.f32.mrb[4].mxu0 }
 0x65d   :  { %v503_v8 = vpop.f32.mrb[5].mxu0 }
 0x65e   :  { %v934_v9 = vpop.f32.mrb[6].mxu0 }
 0x65f   :  { %v1002_v52 = vpack.i.bf16 %v934_v9, %v933_v7  ;;  %v506_v10 = vpop.f32.mrb[7].mxu0 }
 0x661   :  { %1003 = vrot.lane.b32.xlu1 %v1002_v52, %s1172_s25 }
 0x664   :  { %v937_v11 = vpop.f32.mrb[8].mxu0 }
 0x665   :  { %v519_v12 = vpop.f32.mrb[9].mxu0 }
 0x666   :  { %v938_v13 = vpop.f32.mrb[10].mxu0 }
 0x667   :  { %v1012_v14 = vpack.i.bf16 %v938_v13, %v937_v11  ;;  %v522_v16 = vpop.f32.mrb[11].mxu0  ;;  %v857_v11 = vld [vmem:[#allocation5 + $0x4] ss:$0 sm:$0xff] }
 0x668   :  { %v1007_v17 = vpack.i.bf16 %v522_v16, %v519_v12 }
 0x669   :  { %1013 = vrot.lane.b32.xlu1 %v1012_v14, %s1182_s28 }
 0x66a   :  { %1008 = vrot.lane.b32.xlu0 %v1007_v17, %s1183_s29 }
 0x6d3   :  { %v1004_v18 = vpop.permute.xlu1 %1003 }
 0x6d4   :  { %v1006_v19 = vunpack.i.h.bf16 %v1004_v18  ;;  %v1005_v20 = vunpack.i.l.bf16 %v1004_v18  ;;  %v858_v18 = vld [vmem:[#allocation5 + $0x5] ss:$0 sm:$0xff] }
 0x6d6   :  { %v558_v25 = vsel %vm246_vm6, %v503_v8, %v1005_v20  ;;  %v559_v26 = vsel %vm246_vm6, %v506_v10, %v1006_v19 }
 0x6db   :  { %v1014_v21 = vpop.permute.xlu1 %1013 }
 0x6dc   :  { %v1009_v22 = vpop.permute.xlu0 %1008  ;;  %v1016_v27 = vunpack.i.h.bf16 %v1014_v21  ;;  %v1015_v28 = vunpack.i.l.bf16 %v1014_v21 }
 0x6dd   :  { %v1011_v23 = vunpack.i.h.bf16 %v1009_v22  ;;  %v1010_v24 = vunpack.i.l.bf16 %v1009_v22 }
 0x6df   :  { %v562_v29 = vsel %vm560_vm8, %v559_v26, %v1011_v23  ;;  %v561_v30 = vsel %vm560_vm8, %v558_v25, %v1010_v24  ;;  %v1025_v23 = vld [vmem:[#allocation7 + $0x40] sm:$0xff]   ;;  %v1026_v24 = vld [vmem:[#allocation7 + $0x48] sm:$0xff]   ;;  %v859_v25 = vld [vmem:[#allocation5 + $0x6] ss:$0 sm:$0xff] }
 0x6e0   :  { %v565_v31 = vsel %vm563_vm9, %v562_v29, %v1016_v27  ;;  %v564_v32 = vsel %vm563_vm9, %v561_v30, %v1015_v28  ;;  %960 = vmatpush3.bf16.msra.mxu1 %v1025_v23 }
 0x6e1   :  { %v566_v33 = vpack.c.bf16 %v565_v31, %v564_v32  ;;  %961 = vmatprep.subr.bf16.mxu1 %v1176_v15 }
 0x6e3   :  { %944 = vmatmul.mubr.msk.bf16.vlgmr.msra.gmra.mrb[12].mxu0 %vm95_vm0, %v566_v33 }
 0x6e4   :  { %951 = vmatprep.mubr.msk.bf16.mxu0 %vm1177_vm1, %v1176_v15  ;;  %948 = vmatpush3.bf16.msra.mxu0 %v1021_v50 }
 0x6e5   :  { %949 = vmatprep.subr.bf16.mxu0 %v1176_v15  ;;  %962 = vmatpush3.bf16.msra.mxu1 %v1026_v24 }
 0x6e8   :  { %950 = vmatpush3.bf16.msra.mxu0 %v1022_v51 }
 0x7b6   :  { %v620_v35 = vpop.f32.mrb[12].mxu0 }
 0x7b7   :  { %v621_v36 = vadd.f32 %v853_v34, %v620_v35  ;;  %v945_v37 = vpop.f32.mrb[13].mxu0  ;;  %v863_v35 = vld [vmem:[#allocation5 + $0x7] ss:$0 sm:$0xff] }
 0x7b8   :  { %v623_v38 = vpop.f32.mrb[14].mxu0 }
 0x7b9   :  { %v1352_v39 = vadd.f32 %v621_v36, %v1256_v0  ;;  %v624_v40 = vadd.f32 %v853_v34, %v623_v38  ;;  %v946_v41 = vpop.f32.mrb[15].mxu0 }
 0x7bb   :  { %v1355_v42 = vadd.f32 %v624_v40, %v1258_v1  ;;  %v629_v59 = vsel %vm95_vm0, %v1352_v39, 0.0 }
 0x7bc   :  { %630 = vadd.xlane.f32.xlu0 %v629_v59 }
 0x7bd   :  { %v632_v43 = vsel %vm95_vm0, %v1355_v42, 0.0 }
 0x7be   :  { %633 = vadd.xlane.f32.xlu1 %v632_v43 }
 0x849   :  { %v631_v2 = vpop.xlane.xlu0 %630 }
 0x84a   :  { %v635_v44 = vmul.f32 0.03125, %v631_v2 }
 0x84b   :  { %v634_v45 = vpop.xlane.xlu1 %633 }
 0x84c   :  { %v637_v60 = vsub.f32 %v1352_v39, %v635_v44  ;;  %v636_v0 = vmul.f32 0.03125, %v634_v45 }
 0x84e   :  { %v638_v46 = vsub.f32 %v1355_v42, %v636_v0  ;;  %v639_v47 = vmul.f32 %v637_v60, %v637_v60  ;;  %v671_v13 = vmul.f32 %v857_v11, %v637_v60 }
 0x850   :  { %v641_v1 = vsel %vm95_vm0, %v639_v47, 0.0  ;;  %v640_v48 = vmul.f32 %v638_v46, %v638_v46  ;;  %v672_v14 = vmul.f32 %v857_v11, %v638_v46 }
 0x851   :  { %642 = vadd.xlane.f32.xlu0 %v641_v1 }
 0x852   :  { %v644_v49 = vsel %vm95_vm0, %v640_v48, 0.0 }
 0x855   :  { %645 = vadd.xlane.f32.xlu0 %v644_v49 }
 0x8de   :  { %v643_v55 = vpop.xlane.xlu0 %642 }
 0x8df   :  { %v647_v56 = vmul.f32 0.032258064, %v643_v55 }
 0x8e1   :  { %1067 = vrsqrt.f32 %v647_v56  ;;  %vm651_vm10 = vcmp.eq.f32.partialorder %v647_v56, inf  ;;  %v654_v63 = vand.u32 2147483648, %v647_v56  ;;  %vm653_vm11 = vcmp.eq.f32.partialorder %v647_v56, 0.0 }
 0x8e2   :  { %v646_v57 = vpop.xlane.xlu0 %645 }
 0x8e3   :  { %v648_v58 = vmul.f32 0.032258064, %v646_v57 }
 0x8e5   :  { %1069 = vrsqrt.f32 %v648_v58  ;;  %vm658_vm12 = vcmp.eq.f32.partialorder %v648_v58, inf  ;;  %v661_v8 = vand.u32 2147483648, %v648_v58  ;;  %vm660_vm13 = vcmp.eq.f32.partialorder %v648_v58, 0.0 }
 0x8eb   :  { %v1068_v61 = vpop.eup %1067 }
 0x8ec   :  { %v650_v62 = vmul.f32 %v1068_v61, %v647_v56 }
 0x8ee   :  { %v652_v3 = vsel %vm651_vm10, %v647_v56, %v650_v62 }
 0x8ef   :  { %v1070_v4 = vpop.eup %1069  ;;  %v655_v5 = vsel %vm653_vm11, %v654_v63, %v652_v3 }
 0x8f0   :  { %v663_v6 = vadd.f32 1e-06, %v655_v5  ;;  %v657_v7 = vmul.f32 %v1070_v4, %v648_v58 }
 0x8f2   :  { %1071 = vrcp.f32 %v663_v6  ;;  %v659_v9 = vsel %vm658_vm12, %v648_v58, %v657_v7 }
 0x8f3   :  { %v662_v52 = vsel %vm660_vm13, %v661_v8, %v659_v9 }
 0x8f4   :  { %v664_v10 = vadd.f32 1e-06, %v662_v52 }
 0x8f6   :  { %1073 = vrcp.f32 %v664_v10 }
 0x8fc   :  { %v1072_v12 = vpop.eup %1071 }
 0x8fd   :  { %v673_v16 = vmul.f32 %v1072_v12, %v671_v13 }
 0x8ff   :  { %v679_v20 = vadd.f32 %v858_v18, %v673_v16 }
 0x900   :  { %v1074_v17 = vpop.eup %1073 }
 0x901   :  { %v674_v19 = vmul.f32 %v1074_v17, %v672_v14 }
 0x903   :  { %v680_v21 = vadd.f32 %v858_v18, %v674_v19 }
 0x905   :  { %v681_v22 = vpack.c.bf16 %v680_v21, %v679_v20 }
 0x907   :  { %952 = vmatmul.mubr.msk.bf16.vlgmr.msra.gmra.mrb[16].mxu0 %vm95_vm0, %v681_v22 }
 0x9da   :  { %v735_v26 = vpop.f32.mrb[16].mxu0 }
 0x9db   :  { %v736_v27 = vadd.f32 %v859_v25, %v735_v26  ;;  %v953_v28 = vpop.f32.mrb[17].mxu0 }
 0x9dc   :  { %v738_v29 = vpop.f32.mrb[18].mxu0 }
 0x9dd   :  { %v739_v30 = vadd.f32 %v859_v25, %v738_v29  ;;  %v954_v31 = vpop.f32.mrb[19].mxu0  ;;  %v742_v32 = vmax.f32 %v736_v27, 0.0 }
 0x9df   :  { %v743_v33 = vmax.f32 %v739_v30, 0.0 }
 0x9e1   :  { %v744_v34 = vpack.c.bf16 %v743_v33, %v742_v32 }
 0x9e3   :  { %964 = vmatmul.mubr.msk.bf16.vlgmr.msra.gmra.mrb[8].mxu1 %vm352_vm7, %v744_v34 }
 0xab6   :  { %v810_v36 = vpop.f32.mrb[8].mxu1 }
 0xab7   :  { %v811_v37 = vadd.f32 %v863_v35, %v810_v36  ;;  %v965_v38 = vpop.f32.mrb[9].mxu1 }
 0xab8   :  { %v813_v40 = vpop.f32.mrb[10].mxu1 }
 0xab9   :  { %v817_v15 = vadd.f32 %v811_v37, %v1352_v39  ;;  %v814_v41 = vadd.f32 %v863_v35, %v813_v40  ;;  %v966_v59 = vpop.f32.mrb[11].mxu1 }
 0xabb   :  { %819 = vst.msk [vmem:[#allocation8] sm:$0xff] %vm95_vm0, %v817_v15  ;;  %v818_v43 = vadd.f32 %v814_v41, %v1355_v42 }
 0xabd   :  { %820 = vst.msk [vmem:[#allocation8 + $0x8] sm:$0xff] %vm95_vm0, %v818_v43 }
 0xabe   :  { %1152 = shalt.err (!%p1149_p0)
}
 0xabf   :  { %s1153_s8 = scalar_lea.hbm %s1393_s3, 256 }
 0xac0   :  { %p1154_p1 = scmp.ne.s32.totalorder %s1393_s3, %s1153_s8  ;;  %p1157_p2 = scmp.lt.u32.totalorder %s1153_s8, %s1393_s3 }
 0xac2   :  { %p1159_p3 = pnand %p1157_p2, %p1154_p1 }
 0xac4   :  { %1162 = shalt.err (!%p1159_p3)
}
 0xac5   :  { %832 = dma.vmem_to_hbm [thread:$0]  %s827_s4, 256, %s1393_s3, [#allocation4], %s1171_s24, %s1171_s24, %s1172_s25  }
 0xac6   :  { %1167 = dma.done.wait [#allocation4], 256  }
 0xac7   :  { %1168 = vsyncadd [#allocation4], 4294967040 }
 0xac8   :  { %836 = vsyncpa [#allocation3], 1 }
 0xac9   :  { %837 = vsyncpa [#allocation6], 1 }
 0xaca   :  { %838 = vsyncpa [#allocation4], 1 }

</bundles_post_ra>
